<compile_context>
chip_gen: v6e
topology: v6e:2x2x1
jax: 0.10.0
libtpu: 0.0.40
codegen_flags: <defaults>
</compile_context>

<pallas_src>
import functools

import jax
import jax.numpy as jnp
import numpy as np
from jax import lax
from jax.experimental import pallas as pl
from jax.experimental.pallas import tpu as pltpu

EPS = 1e-5


def _layernorm_rows(h, gamma, beta):
    mu = jnp.mean(h, axis=-1, keepdims=True)
    var = jnp.mean((h - mu) ** 2, axis=-1, keepdims=True)
    return (h - mu) * lax.rsqrt(var + EPS) * gamma + beta


# ----------------------------------------------------------------------------
# Kernel: grid = (batch_blocks, num_layers); one full TransformerBlock per step
# ----------------------------------------------------------------------------
def encoder_kernel(
    x_ref,                      # (RB, E) f32   RB = nb * S
    wqkv_ref,                   # (D, 3D) bf16  [scale*wq^T | wk^T | wv^T]
    wo_ref, bo_ref,             # (E, E) bf16, (1, E) f32
    g1_ref, b1_ref,             # (1, E) f32
    w1_ref, bf1_ref,            # (E, F) bf16, (1, F) f32
    w2_ref, bf2_ref,            # (F, E) bf16, (1, E) f32
    g2_ref, b2_ref,             # (1, E) f32
    o_ref,                      # (RB, E) f32   residual-stream carry
    *, batch_in_block, seq_len, head_count, head_dim, embed_size,
):
    nb, S, H, D, E = batch_in_block, seq_len, head_count, head_dim, embed_size
    RB = nb * S
    layer = pl.program_id(1)

    # Layer 0: seed the carry. The output block index is constant along the
    # layer axis, so o_ref stays resident in VMEM for the whole layer loop and
    # is written back to HBM only once per batch block.
    @pl.when(layer == 0)
    def _():
        o_ref[...] = x_ref[...]

    x = o_ref[...]                                    # (RB, E) f32

    # ---- fused shared-head QKV projection (one MXU matmul) -------------------
    # Head-major gather: H lane slices of width D stacked along the leading
    # (sublane) axis -> rows ordered (h, n, s).
    xh = jnp.concatenate([x[:, h * D:(h + 1) * D] for h in range(H)], axis=0)
    qkv = jnp.dot(xh.astype(jnp.bfloat16), wqkv_ref[...],
                  preferred_element_type=jnp.float32)  # (H*RB, 3D) f32
    q = qkv[:, :D].reshape(H * nb, S, D)               # scale already folded in
    k = qkv[:, D:2 * D].reshape(H * nb, S, D)
    v = qkv[:, 2 * D:].reshape(H * nb, S, D)

    # ---- batched scaled dot-product attention --------------------------------
    energy = jnp.einsum(
        "bqd,bkd->bqk", q.astype(jnp.bfloat16), k.astype(jnp.bfloat16),
        preferred_element_type=jnp.float32)            # (H*nb, S, S)
    energy = energy - jnp.max(energy, axis=-1, keepdims=True)
    p = jnp.exp(energy)
    p = p * pl.reciprocal(jnp.sum(p, axis=-1, keepdims=True), approx=True)
    ctx = jnp.einsum(
        "bqk,bkd->bqd", p.astype(jnp.bfloat16), v.astype(jnp.bfloat16),
        preferred_element_type=jnp.float32)            # (H*nb, S, D)

    # Merge heads back to the (RB, E) residual-stream layout:
    # ctx rows are (h, n, s); regroup to (H, RB, D) then lane-concat per head.
    ctx3 = ctx.reshape(H, RB, D)
    attn = jnp.concatenate([ctx3[h] for h in range(H)], axis=-1)   # (RB, E)

    attn_out = jnp.dot(attn.astype(jnp.bfloat16), wo_ref[...],
                       preferred_element_type=jnp.float32) + bo_ref[...]

    # ---- residual + LayerNorm 1 ----------------------------------------------
    x1 = _layernorm_rows(attn_out + x, g1_ref[...], b1_ref[...])

    # ---- feed-forward: Linear -> ReLU -> Linear ------------------------------
    ff = jnp.dot(x1.astype(jnp.bfloat16), w1_ref[...],
                 preferred_element_type=jnp.float32) + bf1_ref[...]
    ff = jnp.maximum(ff, 0.0)
    ff = jnp.dot(ff.astype(jnp.bfloat16), w2_ref[...],
                 preferred_element_type=jnp.float32) + bf2_ref[...]

    # ---- residual + LayerNorm 2 ----------------------------------------------
    out = _layernorm_rows(ff + x1, g2_ref[...], b2_ref[...])

    o_ref[...] = out.astype(o_ref.dtype)


# ----------------------------------------------------------------------------
# Wrapper: embedding lookup in plain JAX glue; all transformer layers in one
# pallas_call (weights stacked with a leading layer axis).
# ----------------------------------------------------------------------------
def encoder_pallas(tokens, params, head_count, *, batch_blocks=1):
    S = tokens.shape[1]
    word = params["word_emb"][tokens]                    # (N, S, E)
    pos = params["pos_emb"][jnp.arange(S)][None, :, :]   # (1, S, E)
    x = (word + pos).astype(jnp.float32)                 # dropout p=0 -> identity

    N, S, E = x.shape
    H = head_count
    D = E // H
    layers = params["layers"]
    L = len(layers)
    F = layers[0]["w1"].shape[0]
    scale = 1.0 / (E ** 0.5)                             # PyTorch module scaling

    assert N % batch_blocks == 0, "batch must split evenly into batch_blocks"
    nb = N // batch_blocks        # batch elements per grid block
    RB = nb * S                   # rows per grid block

    # Stack per-layer params with a leading layer axis. Matmul weights are kept
    # in bf16 (halves weight DMA; f32 accumulation on the MXU); biases / LN
    # params stay f32.  Softmax scale is folded into the Q weight.
    def stk(fn, dtype=jnp.float32):
        return jnp.stack([fn(p) for p in layers]).astype(dtype)

    wqkv = stk(lambda p: jnp.concatenate(
        [p["wq"].T * scale, p["wk"].T, p["wv"].T], axis=1), jnp.bfloat16)  # (L, D, 3D)
    wo   = stk(lambda p: p["wo"].T, jnp.bfloat16)         # (L, E, E)
    bo   = stk(lambda p: p["bo"].reshape(1, E))           # (L, 1, E)
    g1   = stk(lambda p: p["g1"].reshape(1, E))
    b1   = stk(lambda p: p["b1"].reshape(1, E))
    w1   = stk(lambda p: p["w1"].T, jnp.bfloat16)         # (L, E, F)
    bf1  = stk(lambda p: p["bf1"].reshape(1, F))
    w2   = stk(lambda p: p["w2"].T, jnp.bfloat16)         # (L, F, E)
    bf2  = stk(lambda p: p["bf2"].reshape(1, E))
    g2   = stk(lambda p: p["g2"].reshape(1, E))
    b2   = stk(lambda p: p["b2"].reshape(1, E))

    weights = [wqkv, wo, bo, g1, b1, w1, bf1, w2, bf2, g2, b2]

    def wspec(a):
        # Leading layer dim selected by the grid's layer axis and squeezed out.
        return pl.BlockSpec((None,) + tuple(a.shape[1:]), lambda b, l: (l, 0, 0))

    x2d = x.reshape(N * S, E)

    # Advisory cost estimate so XLA can schedule the embedding glue around us.
    flops = 2 * L * (
        (N * S * H) * D * (3 * D)          # fused QKV projection
        + 2 * (N * H) * S * S * D          # energy + context
        + N * S * E * E                    # output projection
        + 2 * N * S * E * F                # feed-forward
    )
    transcendentals = L * (N * H * S * S + N * H * S + 2 * N * S)
    bytes_accessed = (2 * N * S * E * 4
                      + sum(int(w.size) * w.dtype.itemsize for w in weights))

    kernel = functools.partial(
        encoder_kernel,
        batch_in_block=nb, seq_len=S, head_count=H, head_dim=D, embed_size=E,
    )

    out2d = pl.pallas_call(
        kernel,
        out_shape=jax.ShapeDtypeStruct((N * S, E), jnp.float32),
        grid_spec=pltpu.PrefetchScalarGridSpec(
            num_scalar_prefetch=0,
            grid=(batch_blocks, L),              # layer axis innermost (carry)
            in_specs=[pl.BlockSpec((RB, E), lambda b, l: (b, 0))]
            + [wspec(a) for a in weights],
            out_specs=pl.BlockSpec((RB, E), lambda b, l: (b, 0)),
        ),
        compiler_params=pltpu.CompilerParams(
            # batch axis parallel (set batch_blocks=2 on v7x to feed both TCs),
            # layer axis sequential (residual-stream carry).
            dimension_semantics=("parallel", "arbitrary"),
            vmem_limit_bytes=32 * 1024 * 1024,   # explicit, safe on v5e/v6e/v7x
        ),
        cost_estimate=pl.CostEstimate(
            flops=flops, transcendentals=transcendentals,
            bytes_accessed=bytes_accessed),
    )(x2d, *weights)

    return out2d.reshape(N, S, E)


# ----------------------------------------------------------------------------
# Pure-JAX reference (mirrors PyTorch module math), for correctness check
# ----------------------------------------------------------------------------
def _layernorm(x, g, b):
    mu = jnp.mean(x, axis=-1, keepdims=True)
    var = jnp.mean((x - mu) ** 2, axis=-1, keepdims=True)
    return (x - mu) * lax.rsqrt(var + EPS) * g + b


def ref_block(x, p, H):
    N, S, E = x.shape
    D = E // H
    xh = x.reshape(N, S, H, D)
    k = jnp.einsum("nshd,od->nsho", xh, p["wk"])
    v = jnp.einsum("nshd,od->nsho", xh, p["wv"])
    q = jnp.einsum("nshd,od->nsho", xh, p["wq"])
    energy = jnp.einsum("nqhd,nkhd->nhqk", q, k)
    soft = jax.nn.softmax(energy / (E ** 0.5), axis=3)
    att = jnp.einsum("nhqk,nkhd->nqhd", soft, v).reshape(N, S, E)
    att = att @ p["wo"].T + p["bo"]
    x1 = _layernorm(att + x, p["g1"], p["b1"])
    ff = jax.nn.relu(x1 @ p["w1"].T + p["bf1"]) @ p["w2"].T + p["bf2"]
    return _layernorm(ff + x1, p["g2"], p["b2"])


def ref_encoder(tokens, params, H):
    N, S = tokens.shape
    out = params["word_emb"][tokens] + params["pos_emb"][jnp.arange(S)][None]
    for layer in params["layers"]:
        out = ref_block(out, layer, H)
    return out


# ----------------------------------------------------------------------------
# Deterministic parameter init (PyTorch-like shapes / default inits)
# ----------------------------------------------------------------------------
def init_params(key, vocab, max_len, E, H, num_layers, expansion):
    D = E // H
    F = expansion * E

    def lin_w(k, fan_in, shape):
        bound = 1.0 / np.sqrt(fan_in)
        return jax.random.uniform(k, shape, jnp.float32, -bound, bound)

    key, kw, kp = jax.random.split(key, 3)
    params = {
        "word_emb": jax.random.normal(kw, (vocab, E), jnp.float32),
        "pos_emb": jax.random.normal(kp, (max_len, E), jnp.float32),
        "layers": [],
    }
    for _ in range(num_layers):
        key, *ks = jax.random.split(key, 11)
        layer = {
            "wq": lin_w(ks[0], D, (D, D)),
            "wk": lin_w(ks[1], D, (D, D)),
            "wv": lin_w(ks[2], D, (D, D)),
            "wo": lin_w(ks[3], E, (E, E)),
            "bo": lin_w(ks[4], E, (E,)),
            "g1": jnp.ones((E,), jnp.float32),
            "b1": jnp.zeros((E,), jnp.float32),
            "w1": lin_w(ks[5], E, (F, E)),
            "bf1": lin_w(ks[6], E, (F,)),
            "w2": lin_w(ks[7], F, (E, F)),
            "bf2": lin_w(ks[8], F, (E,)),
            "g2": jnp.ones((E,), jnp.float32),
            "b2": jnp.zeros((E,), jnp.float32),
        }
        params["layers"].append(layer)
    return params


if __name__ == "__main__":
    SRC_VOCAB = 50
    EMBED = 32
    NUM_LAYERS = 2
    HEADS = 4
    EXPANSION = 4
    MAX_LEN = 16
    BATCH = 2
    SEQ = 8

    root = jax.random.PRNGKey(0)
    kp, kx = jax.random.split(root)
    params = init_params(kp, SRC_VOCAB, MAX_LEN, EMBED, HEADS, NUM_LAYERS, EXPANSION)
    tokens = jax.random.randint(kx, (BATCH, SEQ), 0, SRC_VOCAB, dtype=jnp.int32)

    out = jax.block_until_ready(encoder_pallas(tokens, params, HEADS))
    ref = jax.block_until_ready(ref_encoder(tokens, params, HEADS))

    assert out.shape == (BATCH, SEQ, EMBED)
    # bf16 MXU operands (f32 accumulation) + EUP approx-reciprocal softmax
    # denominator -> slightly looser tolerance than a pure-f32 comparison.
    assert jnp.allclose(out, ref, rtol=3e-2, atol=3e-2), "mismatch vs JAX reference"

    print("KERNEL_OK")
</pallas_src>

<mosaic_0001>
module attributes {stable_mosaic.version = 11 : i64} {
  func.func @encoder_kernel(%arg0: i32, %arg1: i32, %arg2: memref<16x32xf32, #tpu.memory_space<vmem>>, %arg3: memref<1x8x24xbf16, #tpu.memory_space<vmem>>, %arg4: memref<1x32x32xbf16, #tpu.memory_space<vmem>>, %arg5: memref<1x1x32xf32, #tpu.memory_space<vmem>>, %arg6: memref<1x1x32xf32, #tpu.memory_space<vmem>>, %arg7: memref<1x1x32xf32, #tpu.memory_space<vmem>>, %arg8: memref<1x32x128xbf16, #tpu.memory_space<vmem>>, %arg9: memref<1x1x128xf32, #tpu.memory_space<vmem>>, %arg10: memref<1x128x32xbf16, #tpu.memory_space<vmem>>, %arg11: memref<1x1x32xf32, #tpu.memory_space<vmem>>, %arg12: memref<1x1x32xf32, #tpu.memory_space<vmem>>, %arg13: memref<1x1x32xf32, #tpu.memory_space<vmem>>, %arg14: memref<16x32xf32, #tpu.memory_space<vmem>>) attributes {dimension_semantics = [#tpu.dimension_semantics<parallel>, #tpu.dimension_semantics<arbitrary>], iteration_bounds = array<i64: 1, 2>, scalar_prefetch = 0 : i64, scratch_operands = 0 : i64, tpu.core_type = #tpu.core_type<tc>, window_params = [{transform_indices = @transform_0, window_bounds = array<i64: 16, 32>}, {transform_indices = @transform_1, window_bounds = array<i64: 1, 8, 24>}, {transform_indices = @transform_2, window_bounds = array<i64: 1, 32, 32>}, {transform_indices = @transform_3, window_bounds = array<i64: 1, 1, 32>}, {transform_indices = @transform_4, window_bounds = array<i64: 1, 1, 32>}, {transform_indices = @transform_5, window_bounds = array<i64: 1, 1, 32>}, {transform_indices = @transform_6, window_bounds = array<i64: 1, 32, 128>}, {transform_indices = @transform_7, window_bounds = array<i64: 1, 1, 128>}, {transform_indices = @transform_8, window_bounds = array<i64: 1, 128, 32>}, {transform_indices = @transform_9, window_bounds = array<i64: 1, 1, 32>}, {transform_indices = @transform_10, window_bounds = array<i64: 1, 1, 32>}, {transform_indices = @transform_11, window_bounds = array<i64: 1, 1, 32>}, {transform_indices = @transform_12, window_bounds = array<i64: 16, 32>}]} {
    %c0_i32 = arith.constant 0 : i32
    %0 = arith.cmpi eq, %arg1, %c0_i32 : i32
    %1 = arith.extui %0 : i1 to i32
    %c0_i32_0 = arith.constant 0 : i32
    %2 = arith.cmpi ne, %1, %c0_i32_0 : i32
    scf.if %2 {
      %c0_55 = arith.constant 0 : index
      %c0_56 = arith.constant 0 : index
      %126 = vector.load %arg2[%c0_55, %c0_56] : memref<16x32xf32, #tpu.memory_space<vmem>>, vector<16x32xf32>
      %c0_57 = arith.constant 0 : index
      %c0_58 = arith.constant 0 : index
      %127 = vector.load %arg14[%c0_57, %c0_58] : memref<16x32xf32, #tpu.memory_space<vmem>>, vector<16x32xf32>
      tpu.vector_store %arg14[%c0_57, %c0_58], %126 {strides = array<i32>} : memref<16x32xf32, #tpu.memory_space<vmem>>, vector<16x32xf32>,
    } else {
    }
    %c0 = arith.constant 0 : index
    %c0_1 = arith.constant 0 : index
    %3 = vector.load %arg14[%c0, %c0_1] : memref<16x32xf32, #tpu.memory_space<vmem>>, vector<16x32xf32>
    %4 = vector.extract_strided_slice %3 {offsets = [0, 0], sizes = [16, 8], strides = [1, 1]} : vector<16x32xf32> to vector<16x8xf32>
    %5 = vector.extract_strided_slice %3 {offsets = [0, 8], sizes = [16, 8], strides = [1, 1]} : vector<16x32xf32> to vector<16x8xf32>
    %6 = vector.extract_strided_slice %3 {offsets = [0, 16], sizes = [16, 8], strides = [1, 1]} : vector<16x32xf32> to vector<16x8xf32>
    %7 = vector.extract_strided_slice %3 {offsets = [0, 24], sizes = [16, 8], strides = [1, 1]} : vector<16x32xf32> to vector<16x8xf32>
    %8 = tpu.concatenate %4, %5, %6, %7 in 0 : vector<16x8xf32>, vector<16x8xf32>, vector<16x8xf32>, vector<16x8xf32> -> vector<64x8xf32>
    %9 = arith.truncf %8 : vector<64x8xf32> to vector<64x8xbf16>
    %c0_2 = arith.constant 0 : index
    %c0_3 = arith.constant 0 : index
    %c0_4 = arith.constant 0 : index
    %10 = vector.load %arg3[%c0_2, %c0_3, %c0_4] : memref<1x8x24xbf16, #tpu.memory_space<vmem>>, vector<1x8x24xbf16>
    %11 = vector.shape_cast %10 : vector<1x8x24xbf16> to vector<8x24xbf16>
    %cst = arith.constant dense<0.000000e+00> : vector<64x24xf32>
    %12 = tpu.matmul %9, %11, %cst {dimension_numbers = #tpu.dot_dimension_numbers<[1], [0], [0], [1], [0, 0, 1, 1], [], []>} : vector<64x8xbf16>, vector<8x24xbf16>, vector<64x24xf32> -> vector<64x24xf32>
    %13 = vector.extract_strided_slice %12 {offsets = [0, 0], sizes = [64, 8], strides = [1, 1]} : vector<64x24xf32> to vector<64x8xf32>
    %14 = vector.shape_cast %13 : vector<64x8xf32> to vector<8x8x8xf32>
    %15 = vector.extract_strided_slice %12 {offsets = [0, 8], sizes = [64, 8], strides = [1, 1]} : vector<64x24xf32> to vector<64x8xf32>
    %16 = vector.shape_cast %15 : vector<64x8xf32> to vector<8x8x8xf32>
    %17 = vector.extract_strided_slice %12 {offsets = [0, 16], sizes = [64, 8], strides = [1, 1]} : vector<64x24xf32> to vector<64x8xf32>
    %18 = vector.shape_cast %17 : vector<64x8xf32> to vector<8x8x8xf32>
    %19 = arith.truncf %14 : vector<8x8x8xf32> to vector<8x8x8xbf16>
    %20 = arith.truncf %16 : vector<8x8x8xf32> to vector<8x8x8xbf16>
    "tpu.trace_start"() <{level = 10 : i32, message = "bqd,bkd->bqk"}> : () -> ()
    %cst_5 = arith.constant dense<0.000000e+00> : vector<8x8x8xf32>
    %21 = tpu.matmul %19, %20, %cst_5 {dimension_numbers = #tpu.dot_dimension_numbers<[2], [2], [1], [1], [0, 0, 0, 1, 1, 1], [0], [0]>} : vector<8x8x8xbf16>, vector<8x8x8xbf16>, vector<8x8x8xf32> -> vector<8x8x8xf32>
    "tpu.trace_stop"() : () -> ()
    %cst_6 = arith.constant dense<0xFF800000> : vector<8x8xf32>
    %22 = vector.multi_reduction <maximumf>, %21, %cst_6 [2] : vector<8x8x8xf32> to vector<8x8xf32>
    %23 = vector.shape_cast %22 : vector<8x8xf32> to vector<8x8x1xf32>
    %24 = vector.broadcast %23 : vector<8x8x1xf32> to vector<8x8x8xf32>
    %25 = arith.subf %21, %24 : vector<8x8x8xf32>
    %26 = math.exp %25 : vector<8x8x8xf32>
    %cst_7 = arith.constant dense<0.000000e+00> : vector<8x8xf32>
    %27 = vector.multi_reduction <add>, %26, %cst_7 [2] : vector<8x8x8xf32> to vector<8x8xf32>
    %28 = vector.shape_cast %27 : vector<8x8xf32> to vector<8x8x1xf32>
    %29 = tpu.reciprocal %28 {approx = true} : vector<8x8x1xf32> -> vector<8x8x1xf32>
    %30 = vector.broadcast %29 : vector<8x8x1xf32> to vector<8x8x8xf32>
    %31 = arith.mulf %26, %30 : vector<8x8x8xf32>
    %32 = arith.truncf %31 : vector<8x8x8xf32> to vector<8x8x8xbf16>
    %33 = arith.truncf %18 : vector<8x8x8xf32> to vector<8x8x8xbf16>
    "tpu.trace_start"() <{level = 10 : i32, message = "bqk,bkd->bqd"}> : () -> ()
    %cst_8 = arith.constant dense<0.000000e+00> : vector<8x8x8xf32>
    %34 = tpu.matmul %32, %33, %cst_8 {dimension_numbers = #tpu.dot_dimension_numbers<[2], [1], [1], [2], [0, 0, 0, 1, 1, 2], [0], [0]>} : vector<8x8x8xbf16>, vector<8x8x8xbf16>, vector<8x8x8xf32> -> vector<8x8x8xf32>
    "tpu.trace_stop"() : () -> ()
    %35 = vector.shape_cast %34 : vector<8x8x8xf32> to vector<4x16x8xf32>
    %36 = vector.extract_strided_slice %35 {offsets = [0, 0, 0], sizes = [1, 16, 8], strides = [1, 1, 1]} : vector<4x16x8xf32> to vector<1x16x8xf32>
    %37 = vector.shape_cast %36 : vector<1x16x8xf32> to vector<16x8xf32>
    %38 = vector.extract_strided_slice %35 {offsets = [1, 0, 0], sizes = [1, 16, 8], strides = [1, 1, 1]} : vector<4x16x8xf32> to vector<1x16x8xf32>
    %39 = vector.shape_cast %38 : vector<1x16x8xf32> to vector<16x8xf32>
    %40 = vector.extract_strided_slice %35 {offsets = [2, 0, 0], sizes = [1, 16, 8], strides = [1, 1, 1]} : vector<4x16x8xf32> to vector<1x16x8xf32>
    %41 = vector.shape_cast %40 : vector<1x16x8xf32> to vector<16x8xf32>
    %42 = vector.extract_strided_slice %35 {offsets = [3, 0, 0], sizes = [1, 16, 8], strides = [1, 1, 1]} : vector<4x16x8xf32> to vector<1x16x8xf32>
    %43 = vector.shape_cast %42 : vector<1x16x8xf32> to vector<16x8xf32>
    %44 = tpu.concatenate %37, %39, %41, %43 in 1 : vector<16x8xf32>, vector<16x8xf32>, vector<16x8xf32>, vector<16x8xf32> -> vector<16x32xf32>
    %45 = arith.truncf %44 : vector<16x32xf32> to vector<16x32xbf16>
    %c0_9 = arith.constant 0 : index
    %c0_10 = arith.constant 0 : index
    %c0_11 = arith.constant 0 : index
    %46 = vector.load %arg4[%c0_9, %c0_10, %c0_11] : memref<1x32x32xbf16, #tpu.memory_space<vmem>>, vector<1x32x32xbf16>
    %47 = vector.shape_cast %46 : vector<1x32x32xbf16> to vector<32x32xbf16>
    %cst_12 = arith.constant dense<0.000000e+00> : vector<16x32xf32>
    %48 = tpu.matmul %45, %47, %cst_12 {dimension_numbers = #tpu.dot_dimension_numbers<[1], [0], [0], [1], [0, 0, 1, 1], [], []>} : vector<16x32xbf16>, vector<32x32xbf16>, vector<16x32xf32> -> vector<16x32xf32>
    %c0_13 = arith.constant 0 : index
    %c0_14 = arith.constant 0 : index
    %c0_15 = arith.constant 0 : index
    %49 = vector.load %arg5[%c0_13, %c0_14, %c0_15] : memref<1x1x32xf32, #tpu.memory_space<vmem>>, vector<1x1x32xf32>
    %50 = vector.shape_cast %49 : vector<1x1x32xf32> to vector<1x32xf32>
    %51 = vector.broadcast %50 : vector<1x32xf32> to vector<16x32xf32>
    %52 = arith.addf %48, %51 : vector<16x32xf32>
    %53 = arith.addf %52, %3 : vector<16x32xf32>
    %c0_16 = arith.constant 0 : index
    %c0_17 = arith.constant 0 : index
    %c0_18 = arith.constant 0 : index
    %54 = vector.load %arg6[%c0_16, %c0_17, %c0_18] : memref<1x1x32xf32, #tpu.memory_space<vmem>>, vector<1x1x32xf32>
    %55 = vector.shape_cast %54 : vector<1x1x32xf32> to vector<1x32xf32>
    %c0_19 = arith.constant 0 : index
    %c0_20 = arith.constant 0 : index
    %c0_21 = arith.constant 0 : index
    %56 = vector.load %arg7[%c0_19, %c0_20, %c0_21] : memref<1x1x32xf32, #tpu.memory_space<vmem>>, vector<1x1x32xf32>
    %57 = vector.shape_cast %56 : vector<1x1x32xf32> to vector<1x32xf32>
    %cst_22 = arith.constant dense<0.000000e+00> : vector<16xf32>
    %58 = vector.multi_reduction <add>, %53, %cst_22 [1] : vector<16x32xf32> to vector<16xf32>
    %59 = vector.shape_cast %58 : vector<16xf32> to vector<16x1xf32>
    %cst_23 = arith.constant 3.200000e+01 : f32
    %60 = vector.broadcast %cst_23 : f32 to vector<16x1xf32>
    %61 = arith.divf %59, %60 : vector<16x1xf32>
    %62 = vector.broadcast %61 : vector<16x1xf32> to vector<16x32xf32>
    %63 = arith.subf %53, %62 : vector<16x32xf32>
    %64 = arith.mulf %63, %63 : vector<16x32xf32>
    %cst_24 = arith.constant dense<0.000000e+00> : vector<16xf32>
    %65 = vector.multi_reduction <add>, %64, %cst_24 [1] : vector<16x32xf32> to vector<16xf32>
    %66 = vector.shape_cast %65 : vector<16xf32> to vector<16x1xf32>
    %cst_25 = arith.constant 3.200000e+01 : f32
    %67 = vector.broadcast %cst_25 : f32 to vector<16x1xf32>
    %68 = arith.divf %66, %67 : vector<16x1xf32>
    %69 = vector.broadcast %61 : vector<16x1xf32> to vector<16x32xf32>
    %70 = arith.subf %53, %69 : vector<16x32xf32>
    %cst_26 = arith.constant 9.99999974E-6 : f32
    %71 = vector.broadcast %cst_26 : f32 to vector<16x1xf32>
    %72 = arith.addf %68, %71 : vector<16x1xf32>
    %73 = math.rsqrt %72 : vector<16x1xf32>
    %74 = vector.broadcast %73 : vector<16x1xf32> to vector<16x32xf32>
    %75 = arith.mulf %70, %74 : vector<16x32xf32>
    %76 = vector.broadcast %55 : vector<1x32xf32> to vector<16x32xf32>
    %77 = arith.mulf %75, %76 : vector<16x32xf32>
    %78 = vector.broadcast %57 : vector<1x32xf32> to vector<16x32xf32>
    %79 = arith.addf %77, %78 : vector<16x32xf32>
    %80 = arith.truncf %79 : vector<16x32xf32> to vector<16x32xbf16>
    %c0_27 = arith.constant 0 : index
    %c0_28 = arith.constant 0 : index
    %c0_29 = arith.constant 0 : index
    %81 = vector.load %arg8[%c0_27, %c0_28, %c0_29] : memref<1x32x128xbf16, #tpu.memory_space<vmem>>, vector<1x32x128xbf16>
    %82 = vector.shape_cast %81 : vector<1x32x128xbf16> to vector<32x128xbf16>
    %cst_30 = arith.constant dense<0.000000e+00> : vector<16x128xf32>
    %83 = tpu.matmul %80, %82, %cst_30 {dimension_numbers = #tpu.dot_dimension_numbers<[1], [0], [0], [1], [0, 0, 1, 1], [], []>} : vector<16x32xbf16>, vector<32x128xbf16>, vector<16x128xf32> -> vector<16x128xf32>
    %c0_31 = arith.constant 0 : index
    %c0_32 = arith.constant 0 : index
    %c0_33 = arith.constant 0 : index
    %84 = vector.load %arg9[%c0_31, %c0_32, %c0_33] : memref<1x1x128xf32, #tpu.memory_space<vmem>>, vector<1x1x128xf32>
    %85 = vector.shape_cast %84 : vector<1x1x128xf32> to vector<1x128xf32>
    %86 = vector.broadcast %85 : vector<1x128xf32> to vector<16x128xf32>
    %87 = arith.addf %83, %86 : vector<16x128xf32>
    %cst_34 = arith.constant 0.000000e+00 : f32
    %88 = vector.broadcast %cst_34 : f32 to vector<16x128xf32>
    %89 = arith.maximumf %87, %88 : vector<16x128xf32>
    %90 = arith.truncf %89 : vector<16x128xf32> to vector<16x128xbf16>
    %c0_35 = arith.constant 0 : index
    %c0_36 = arith.constant 0 : index
    %c0_37 = arith.constant 0 : index
    %91 = vector.load %arg10[%c0_35, %c0_36, %c0_37] : memref<1x128x32xbf16, #tpu.memory_space<vmem>>, vector<1x128x32xbf16>
    %92 = vector.shape_cast %91 : vector<1x128x32xbf16> to vector<128x32xbf16>
    %cst_38 = arith.constant dense<0.000000e+00> : vector<16x32xf32>
    %93 = tpu.matmul %90, %92, %cst_38 {dimension_numbers = #tpu.dot_dimension_numbers<[1], [0], [0], [1], [0, 0, 1, 1], [], []>} : vector<16x128xbf16>, vector<128x32xbf16>, vector<16x32xf32> -> vector<16x32xf32>
    %c0_39 = arith.constant 0 : index
    %c0_40 = arith.constant 0 : index
    %c0_41 = arith.constant 0 : index
    %94 = vector.load %arg11[%c0_39, %c0_40, %c0_41] : memref<1x1x32xf32, #tpu.memory_space<vmem>>, vector<1x1x32xf32>
    %95 = vector.shape_cast %94 : vector<1x1x32xf32> to vector<1x32xf32>
    %96 = vector.broadcast %95 : vector<1x32xf32> to vector<16x32xf32>
    %97 = arith.addf %93, %96 : vector<16x32xf32>
    %98 = arith.addf %97, %79 : vector<16x32xf32>
    %c0_42 = arith.constant 0 : index
    %c0_43 = arith.constant 0 : index
    %c0_44 = arith.constant 0 : index
    %99 = vector.load %arg12[%c0_42, %c0_43, %c0_44] : memref<1x1x32xf32, #tpu.memory_space<vmem>>, vector<1x1x32xf32>
    %100 = vector.shape_cast %99 : vector<1x1x32xf32> to vector<1x32xf32>
    %c0_45 = arith.constant 0 : index
    %c0_46 = arith.constant 0 : index
    %c0_47 = arith.constant 0 : index
    %101 = vector.load %arg13[%c0_45, %c0_46, %c0_47] : memref<1x1x32xf32, #tpu.memory_space<vmem>>, vector<1x1x32xf32>
    %102 = vector.shape_cast %101 : vector<1x1x32xf32> to vector<1x32xf32>
    %cst_48 = arith.constant dense<0.000000e+00> : vector<16xf32>
    %103 = vector.multi_reduction <add>, %98, %cst_48 [1] : vector<16x32xf32> to vector<16xf32>
    %104 = vector.shape_cast %103 : vector<16xf32> to vector<16x1xf32>
    %cst_49 = arith.constant 3.200000e+01 : f32
    %105 = vector.broadcast %cst_49 : f32 to vector<16x1xf32>
    %106 = arith.divf %104, %105 : vector<16x1xf32>
    %107 = vector.broadcast %106 : vector<16x1xf32> to vector<16x32xf32>
    %108 = arith.subf %98, %107 : vector<16x32xf32>
    %109 = arith.mulf %108, %108 : vector<16x32xf32>
    %cst_50 = arith.constant dense<0.000000e+00> : vector<16xf32>
    %110 = vector.multi_reduction <add>, %109, %cst_50 [1] : vector<16x32xf32> to vector<16xf32>
    %111 = vector.shape_cast %110 : vector<16xf32> to vector<16x1xf32>
    %cst_51 = arith.constant 3.200000e+01 : f32
    %112 = vector.broadcast %cst_51 : f32 to vector<16x1xf32>
    %113 = arith.divf %111, %112 : vector<16x1xf32>
    %114 = vector.broadcast %106 : vector<16x1xf32> to vector<16x32xf32>
    %115 = arith.subf %98, %114 : vector<16x32xf32>
    %cst_52 = arith.constant 9.99999974E-6 : f32
    %116 = vector.broadcast %cst_52 : f32 to vector<16x1xf32>
    %117 = arith.addf %113, %116 : vector<16x1xf32>
    %118 = math.rsqrt %117 : vector<16x1xf32>
    %119 = vector.broadcast %118 : vector<16x1xf32> to vector<16x32xf32>
    %120 = arith.mulf %115, %119 : vector<16x32xf32>
    %121 = vector.broadcast %100 : vector<1x32xf32> to vector<16x32xf32>
    %122 = arith.mulf %120, %121 : vector<16x32xf32>
    %123 = vector.broadcast %102 : vector<1x32xf32> to vector<16x32xf32>
    %124 = arith.addf %122, %123 : vector<16x32xf32>
    %c0_53 = arith.constant 0 : index
    %c0_54 = arith.constant 0 : index
    %125 = vector.load %arg14[%c0_53, %c0_54] : memref<16x32xf32, #tpu.memory_space<vmem>>, vector<16x32xf32>
    tpu.vector_store %arg14[%c0_53, %c0_54], %124 {strides = array<i32>} : memref<16x32xf32, #tpu.memory_space<vmem>>, vector<16x32xf32>,
    return
  }
  func.func @transform_0(%arg0: i32, %arg1: i32) -> (i32, i32) {
    %c0_i32 = arith.constant 0 : i32
    %c0_i32_0 = arith.constant 0 : i32
    return %arg0, %c0_i32 : i32, i32
  }
  func.func @transform_1(%arg0: i32, %arg1: i32) -> (i32, i32, i32) {
    %c0_i32 = arith.constant 0 : i32
    %c0_i32_0 = arith.constant 0 : i32
    %c0_i32_1 = arith.constant 0 : i32
    return %arg1, %c0_i32, %c0_i32_0 : i32, i32, i32
  }
  func.func @transform_2(%arg0: i32, %arg1: i32) -> (i32, i32, i32) {
    %c0_i32 = arith.constant 0 : i32
    %c0_i32_0 = arith.constant 0 : i32
    %c0_i32_1 = arith.constant 0 : i32
    return %arg1, %c0_i32, %c0_i32_0 : i32, i32, i32
  }
  func.func @transform_3(%arg0: i32, %arg1: i32) -> (i32, i32, i32) {
    %c0_i32 = arith.constant 0 : i32
    %c0_i32_0 = arith.constant 0 : i32
    %c0_i32_1 = arith.constant 0 : i32
    return %arg1, %c0_i32, %c0_i32_0 : i32, i32, i32
  }
  func.func @transform_4(%arg0: i32, %arg1: i32) -> (i32, i32, i32) {
    %c0_i32 = arith.constant 0 : i32
    %c0_i32_0 = arith.constant 0 : i32
    %c0_i32_1 = arith.constant 0 : i32
    return %arg1, %c0_i32, %c0_i32_0 : i32, i32, i32
  }
  func.func @transform_5(%arg0: i32, %arg1: i32) -> (i32, i32, i32) {
    %c0_i32 = arith.constant 0 : i32
    %c0_i32_0 = arith.constant 0 : i32
    %c0_i32_1 = arith.constant 0 : i32
    return %arg1, %c0_i32, %c0_i32_0 : i32, i32, i32
  }
  func.func @transform_6(%arg0: i32, %arg1: i32) -> (i32, i32, i32) {
    %c0_i32 = arith.constant 0 : i32
    %c0_i32_0 = arith.constant 0 : i32
    %c0_i32_1 = arith.constant 0 : i32
    return %arg1, %c0_i32, %c0_i32_0 : i32, i32, i32
  }
  func.func @transform_7(%arg0: i32, %arg1: i32) -> (i32, i32, i32) {
    %c0_i32 = arith.constant 0 : i32
    %c0_i32_0 = arith.constant 0 : i32
    %c0_i32_1 = arith.constant 0 : i32
    return %arg1, %c0_i32, %c0_i32_0 : i32, i32, i32
  }
  func.func @transform_8(%arg0: i32, %arg1: i32) -> (i32, i32, i32) {
    %c0_i32 = arith.constant 0 : i32
    %c0_i32_0 = arith.constant 0 : i32
    %c0_i32_1 = arith.constant 0 : i32
    return %arg1, %c0_i32, %c0_i32_0 : i32, i32, i32
  }
  func.func @transform_9(%arg0: i32, %arg1: i32) -> (i32, i32, i32) {
    %c0_i32 = arith.constant 0 : i32
    %c0_i32_0 = arith.constant 0 : i32
    %c0_i32_1 = arith.constant 0 : i32
    return %arg1, %c0_i32, %c0_i32_0 : i32, i32, i32
  }
  func.func @transform_10(%arg0: i32, %arg1: i32) -> (i32, i32, i32) {
    %c0_i32 = arith.constant 0 : i32
    %c0_i32_0 = arith.constant 0 : i32
    %c0_i32_1 = arith.constant 0 : i32
    return %arg1, %c0_i32, %c0_i32_0 : i32, i32, i32
  }
  func.func @transform_11(%arg0: i32, %arg1: i32) -> (i32, i32, i32) {
    %c0_i32 = arith.constant 0 : i32
    %c0_i32_0 = arith.constant 0 : i32
    %c0_i32_1 = arith.constant 0 : i32
    return %arg1, %c0_i32, %c0_i32_0 : i32, i32, i32
  }
  func.func @transform_12(%arg0: i32, %arg1: i32) -> (i32, i32) {
    %c0_i32 = arith.constant 0 : i32
    %c0_i32_0 = arith.constant 0 : i32
    return %arg0, %c0_i32 : i32, i32
  }
}

</mosaic_0001>

<bundles_post_ra>
// kernel: tpu_custom_call.1
= control target key start
LH: loop header
LB: loop body
LE: loop exit
PB: predicated region body
PF: predicated region fallthrough
CT: control target
= control target key end

     0   :  { %s3017_s0 = inlined_call_operand.vmem [shape: f32[16,32], index: 0, kind: input, shape index: {}]   ;;  %s3018_s1 = inlined_call_operand.vmem [shape: bf16[2,8,24], index: 1, kind: input, shape index: {}]   ;;  %s3019_s2 = inlined_call_operand.vmem [shape: bf16[2,32,32], index: 2, kind: input, shape index: {}]   ;;  %s3020_s3 = inlined_call_operand.vmem [shape: f32[2,1,32], index: 3, kind: input, shape index: {}]   ;;  %s3021_s4 = inlined_call_operand.vmem [shape: f32[2,1,32], index: 4, kind: input, shape index: {}]   ;;  %s3022_s5 = inlined_call_operand.vmem [shape: f32[2,1,32], index: 5, kind: input, shape index: {}]   ;;  %s3023_s6 = inlined_call_operand.vmem [shape: bf16[2,32,128], index: 6, kind: input, shape index: {}]   ;;  %s3024_s7 = inlined_call_operand.vmem [shape: f32[2,1,128], index: 7, kind: input, shape index: {}]   ;;  %s3025_s8 = inlined_call_operand.vmem [shape: bf16[2,128,32], index: 8, kind: input, shape index: {}]   ;;  %s3026_s9 = inlined_call_operand.vmem [shape: f32[2,1,32], index: 9, kind: input, shape index: {}]   ;;  %s3027_s10 = inlined_call_operand.vmem [shape: f32[2,1,32], index: 10, kind: input, shape index: {}]   ;;  %s3028_s11 = inlined_call_operand.vmem [shape: f32[2,1,32], index: 11, kind: input, shape index: {}]   ;;  %s3029_s12 = inlined_call_operand.hbm [shape: f32[16,32], index: 12, kind: output, shape index: {}]  }
   0x1   :  { %3033 = sst [smem:[#allocation8_spill]] %s3017_s0 }
   0x2   :  { %3034 = sst [smem:[#allocation9_spill]] %s3018_s1 }
   0x3   :  { %3035 = sst [smem:[#allocation10_spill]] %s3029_s12 }
   0x4   :  { %17 = vsyncpa [#allocation3], 0  ;;  %s2654_s21 = smov 0   ;;  %s2656_s22 = smov 0  }
   0x5   :  { %s2658_s23 = smov 0  }
   0x6 LB: > { %3036 = sst [smem:[#allocation5_spill]] %s2573_s22  ;;  %s32_s25 = sadd.s32 1, %s2573_s22  ;;  %s2577_s23 = sphi %s2658_s23, %s23_s23   ;;  %s2573_s22 = sphi %s2656_s22, %s3051_s22   ;;  %s2569_s21 = sphi %s2654_s21, %s3050_s21  }
   0x7   : > { %3037 = sst [smem:[#allocation6_spill]] %s2577_s23  ;;  %p33_p0 = scmp.ge.s32.totalorder %s32_s25, 2 }
   0x8   : > { %p2153_p1 = scmp.ge.s32.totalorder %s2577_s23, 1  ;;  %p471_p2 = scmp.lt.s32.totalorder %s2577_s23, 3 }
   0x9   : > { %s3053_s25 = smov (%p33_p0, %s32_s25), 0 }
   0xa   : > { %3038 = sst [smem:[#allocation7_spill]] %s3053_s25  ;;  %p472_p3 = pnand %p2153_p1, %p471_p2 }
   0xb   : > { %p554_p4 = scmp.lt.s32.totalorder (!%p472_p3), %s2569_s21, 1  ;;  %s3039_s1 = sld [smem:[#allocation9_spill]] (!%p472_p3) }
   0xc   : > { %475 = sbr.rel (%p472_p3) target bundleno = 2612 (0xa34), region = 68  ;;  %p2161_p5 = scmp.ne.s32.totalorder (!%p472_p3), %s2569_s21, 0 }
  0x11   : > { %s2673_s26 = scalar_select %p554_p4, %s2569_s21, 1 }
  0x12   : > { %s3040_s15 = sld [smem:[#allocation8_spill]] (!%p2161_p5) }
  0x13   : > { %s2154_s27 = sshll.u32 %s2673_s26, 2  ;;  %s2207_s28 = sshll.u32 %s2673_s26, 4 }
  0x14   : > { %s557_s13 = scalar_lea.vmem %s3039_s1, %s2154_s27  ;;  %s2683_s16 = scalar_lea.vmem %s3019_s2, %s2207_s28 }
  0x15   : > { %s2700_s27 = scalar_lea.vmem %s3023_s6, %s2207_s28  ;;  %s2209_s1 = sshll.u32 %s2673_s26, 6 }
  0x16   : > { %s2710_s19 = scalar_lea.vmem %s3025_s8, %s2209_s1  ;;  %s587_s12 = scalar_lea.vmem %s3026_s9, %s2673_s26 }
  0x17   : > { %s590_s0 = scalar_lea.vmem %s3027_s10, %s2673_s26  ;;  %s593_s25 = scalar_lea.vmem %s3028_s11, %s2673_s26 }
  0x18   : > { %599 = sbr.rel (%p2161_p5) target bundleno = 31 (0x1f), region = 72 }
  0x1d   : > { %v600_v0 = vld [vmem:[%s3040_s15] sm:$0xff]  ;;  %vm602_vm0 = vcmask 261120   ;;  %v601_v1 = vld [vmem:[%s3040_s15 + $0x8] sm:$0xff] }
  0x1e   : > { %603 = vst.msk [vmem:[#allocation2] sm:$0xff] %vm602_vm0, %v600_v0  ;;  %604 = vst.msk [vmem:[#allocation2 + $0x8] sm:$0xff] %vm602_vm0, %v601_v1 }
  0x1f PF: > { %v631_v4 = vld [vmem:[%s557_s13] sm:$0xf]  ;;  %vm645_vm1 = vcmask 1043456   ;;  %vm632_vm2 = vcmask 64512   ;;  %s2579_s21 = smov 120   ;;  %s2580_s23 = smov 104  }
  0x20   : > { %2404 = vmatprep.subr.msk.bf16.mxu1 %vm645_vm1, %v631_v4  ;;  %v647_v6 = vsel %vm645_vm1, %v631_v4, 0  ;;  %s2581_s13 = smov 112   ;;  %v2582_v20 = vmov 0.0   ;;  %vm2583_vm3 = vmmov 0   ;;  %s2584_s18 = smov 8   ;;  %vm1620_vm4 = vcmask 130048  }
  0x21   : > { %2263 = vmatpush3.bf16.msra.mxu1 %v647_v6  ;;  %2284 = vmatprep.subr.bf16.mxu0 %v2582_v20  ;;  %s2585_s24 = smov 16   ;;  %s2586_s20 = smov 24   ;;  %vm1623_vm5 = vcmask 195584   ;;  %vm1650_vm6 = vcmask 261120  }
  0x22   : > { %2272 = vmatprep.subr.bf16.mxu1 %v2582_v20  ;;  %2286 = vmatprep.mubr.msk.bf16.mxu0 %vm2583_vm3, %v2582_v20  ;;  %s3041_s28 = scalar_lea.vmem %s3020_s3, %s2673_s26  ;;  %s3042_s30 = scalar_lea.vmem %s3021_s4, %s2673_s26 }
  0x23   : > { %s3043_s17 = scalar_lea.vmem %s3022_s5, %s2673_s26 }
  0x25   : > { %v2730_v2 = vld [vmem:[#allocation2] sm:$0xff]  ;;  %v2732_v3 = vld [vmem:[#allocation2 + $0x8] sm:$0xff] }
  0x26   : > { %v2445_v5 = vpack.i.bf16 %v2732_v3, %v2730_v2  ;;  %v627_v7 = vpack.c.bf16 %v2732_v3, %v2730_v2 }
  0x28   : > { %2446 = vrot.lane.b32.xlu0 %v2445_v5, %s2579_s21  ;;  %2456 = vrot.lane.b32.xlu1 %v2445_v5, %s2580_s23 }
  0x29   : > { %2264 = vmatprep.mubr.msk.bf16.mxu1 %vm632_vm2, %v627_v7 }
  0x2c   : > { %2451 = vrot.lane.b32.xlu0 %v2445_v5, %s2581_s13 }
  0x9a   : > { %v2447_v8 = vpop.permute.xlu0 %2446  ;;  %v2457_v11 = vpop.permute.xlu1 %2456 }
  0x9b   : > { %v2449_v9 = vunpack.i.h.bf16 %v2447_v8  ;;  %v2448_v10 = vunpack.i.l.bf16 %v2447_v8  ;;  %v2459_v16 = vunpack.i.h.bf16 %v2457_v11  ;;  %v2458_v17 = vunpack.i.l.bf16 %v2457_v11 }
  0x9d   : > { %v628_v12 = vpack.c.bf16 %v2449_v9, %v2448_v10  ;;  %v630_v19 = vpack.c.bf16 %v2459_v16, %v2458_v17 }
  0x9e   : > { %v2452_v13 = vpop.permute.xlu0 %2451 }
  0x9f   : > { %2265 = vmatmul.mubr.msk.bf16.vlgmr.msra.gmra.mxu1 %vm632_vm2, %v628_v12  ;;  %v2454_v14 = vunpack.i.h.bf16 %v2452_v13  ;;  %v2453_v15 = vunpack.i.l.bf16 %v2452_v13 }
  0xa1   : > { %v629_v18 = vpack.c.bf16 %v2454_v14, %v2453_v15 }
  0xa3   : > { %2268 = vmatprep.mubr.msk.bf16.mxu1 %vm632_vm2, %v629_v18 }
  0xa7   : > { %2269 = vmatmul.mubr.msk.bf16.gmra.mxu1 %vm632_vm2, %v630_v19 }
  0xa8   : > { %2274 = vmatprep.mubr.msk.bf16.mxu1 %vm2583_vm3, %v2582_v20 }
 0x15f   : > { %v2266_v21 = vpop.f32.mrf.mxu1 }
 0x160   : > { %v2753_v26 = vpack.c.bf16 %v2266_v21, %v2266_v21 }
 0x161   : > { %v683_v22 = vpop.f32.mrf.mxu1 }
 0x162   : > { %v714_v23 = vpack.c.bf16 %v683_v22, %v683_v22 }
 0x163   : > { %v2267_v24 = vpop.f32.mrf.mxu1 }
 0x164   : > { %723 = vrot.lane.b32.xlu1 %v714_v23, %s2579_s21  ;;  %v2758_v30 = vpack.c.bf16 %v2267_v24, %v2267_v24 }
 0x165   : > { %v686_v25 = vpop.f32.mrf.mxu1 }
 0x166   : > { %v715_v27 = vpack.c.bf16 %v686_v25, %v686_v25 }
 0x167   : > { %v2270_v28 = vpop.f32.mrf.mxu1 }
 0x168   : > { %821 = vrot.lane.b32.xlu1 %v2753_v26, %s2579_s21  ;;  %772 = vrot.lane.b32.xlu0 %v715_v27, %s2579_s21  ;;  %v2762_v33 = vpack.c.bf16 %v2270_v28, %v2270_v28 }
 0x169   : > { %v699_v29 = vpop.f32.mrf.mxu1 }
 0x16a   : > { %v2760_v31 = vpack.c.bf16 %v699_v29, %v699_v29 }
 0x16b   : > { %v2271_v32 = vpop.f32.mrf.mxu1 }
 0x16c   : > { %870 = vrot.lane.b32.xlu0 %v2758_v30, %s2579_s21  ;;  %919 = vrot.lane.b32.xlu1 %v2760_v31, %s2579_s21  ;;  %v2770_v36 = vpack.c.bf16 %v2271_v32, %v2271_v32 }
 0x16d   : > { %v702_v34 = vpop.f32.mrf.mxu1 }
 0x16e   : > { %v2768_v35 = vpack.c.bf16 %v702_v34, %v702_v34 }
 0x170   : > { %1017 = vrot.lane.b32.xlu1 %v2762_v33, %s2579_s21  ;;  %968 = vrot.lane.b32.xlu0 %v2768_v35, %s2579_s21 }
 0x174   : > { %1258 = vrot.lane.b32.xlu1 %v715_v27, %s2581_s13  ;;  %1066 = vrot.lane.b32.xlu0 %v2770_v36, %s2579_s21 }
 0x178   : > { %1210 = vrot.lane.b32.xlu0 %v714_v23, %s2581_s13 }
 0x1d6   : > { %v724_v37 = vpop.permute.xlu1 %723 }
 0x1d7   : > { %v729_v38 = vsel %vm632_vm2, %v724_v37, 0 }
 0x1d8   : > { %2273 = vmatpush3.bf16.xpose.msra.mxu1 %v729_v38 }
 0x1d9   : > { %2278 = vmatprep.subr.bf16.mxu1 %v2582_v20 }
 0x1da   : > { %v822_v39 = vpop.permute.xlu1 %821  ;;  %v773_v40 = vpop.permute.xlu0 %772 }
 0x1db   : > { %v827_v41 = vsel %vm632_vm2, %v822_v39, 0  ;;  %v778_v43 = vsel %vm632_vm2, %v773_v40, 0 }
 0x1dc   : > { %2285 = vmatpush3.bf16.xpose.msra.mxu0 %v827_v41 }
 0x1dd   : > { %2296 = vmatprep.subr.bf16.mxu0 %v2582_v20 }
 0x1de   : > { %v871_v42 = vpop.permute.xlu0 %870  ;;  %v920_v44 = vpop.permute.xlu1 %919 }
 0x1df   : > { %2275 = vmatmul.mubr.msk.bf16.vlgmr.msra.gmra.mxu1 %vm632_vm2, %v714_v23  ;;  %v925_v45 = vsel %vm632_vm2, %v920_v44, 0  ;;  %v876_v47 = vsel %vm632_vm2, %v871_v42, 0 }
 0x1e0   : > { %2279 = vmatpush3.bf16.xpose.msra.mxu1 %v778_v43  ;;  %2280 = vmatprep.mubr.msk.bf16.mxu1 %vm2583_vm3, %v2582_v20 }
 0x1e1   : > { %2290 = vmatprep.subr.bf16.mxu1 %v2582_v20 }
 0x1e2   : > { %v969_v46 = vpop.permute.xlu0 %968  ;;  %v1018_v48 = vpop.permute.xlu1 %1017 }
 0x1e3   : > { %2287 = vmatmul.mubr.msk.bf16.vlgmr.msra.gmra.mxu0 %vm632_vm2, %v2753_v26  ;;  %v1023_v49 = vsel %vm632_vm2, %v1018_v48, 0  ;;  %v974_v51 = vsel %vm632_vm2, %v969_v46, 0 }
 0x1e4   : > { %2297 = vmatpush3.bf16.xpose.msra.mxu0 %v925_v45  ;;  %2298 = vmatprep.mubr.msk.bf16.mxu0 %vm2583_vm3, %v2582_v20 }
 0x1e5   : > { %2308 = vmatprep.subr.bf16.mxu0 %v2582_v20 }
 0x1e6   : > { %v1067_v50 = vpop.permute.xlu0 %1066  ;;  %v1259_v55 = vpop.permute.xlu1 %1258 }
 0x1e7   : > { %2281 = vmatmul.mubr.msk.bf16.vlgmr.msra.gmra.mxu1 %vm632_vm2, %v715_v27  ;;  %v1072_v54 = vsel %vm632_vm2, %v1067_v50, 0  ;;  %v1264_v56 = vsel %vm645_vm1, %v1259_v55, 0 }
 0x1e8   : > { %2291 = vmatpush3.bf16.xpose.msra.mxu1 %v876_v47  ;;  %2292 = vmatprep.mubr.msk.bf16.mxu1 %vm2583_vm3, %v2582_v20 }
 0x1e9   : > { %2302 = vmatprep.subr.bf16.mxu1 %v2582_v20 }
 0x1ea   : > { %v1211_v52 = vpop.permute.xlu0 %1210 }
 0x1eb   : > { %2299 = vmatmul.mubr.msk.bf16.vlgmr.msra.gmra.mxu0 %vm632_vm2, %v2760_v31  ;;  %v1216_v53 = vsel %vm645_vm1, %v1211_v52, 0 }
 0x1ec   : > { %2309 = vmatpush3.bf16.xpose.msra.mxu0 %v1023_v49  ;;  %2310 = vmatprep.mubr.msk.bf16.mxu0 %vm2583_vm3, %v2582_v20 }
 0x1ed   : > { %2320 = vmatprep.subr.bf16.mxu0 %v2582_v20 }
 0x1ef   : > { %2293 = vmatmul.mubr.msk.bf16.vlgmr.msra.gmra.mxu1 %vm632_vm2, %v2758_v30 }
 0x1f0   : > { %2303 = vmatpush3.bf16.xpose.msra.mxu1 %v974_v51  ;;  %2304 = vmatprep.mubr.msk.bf16.mxu1 %vm2583_vm3, %v2582_v20 }
 0x1f1   : > { %2314 = vmatprep.subr.bf16.mxu1 %v2582_v20 }
 0x1f3   : > { %2311 = vmatmul.mubr.msk.bf16.vlgmr.msra.gmra.mxu0 %vm632_vm2, %v2762_v33 }
 0x1f4   : > { %2321 = vmatpush3.bf16.msra.mxu0 %v1216_v53  ;;  %2322 = vmatprep.mubr.msk.bf16.mxu0 %vm2583_vm3, %v2582_v20 }
 0x1f5   : > { %2332 = vmatprep.subr.bf16.mxu0 %v2582_v20 }
 0x1f7   : > { %2305 = vmatmul.mubr.msk.bf16.vlgmr.msra.gmra.mxu1 %vm632_vm2, %v2768_v35 }
 0x1f8   : > { %2315 = vmatpush3.bf16.xpose.msra.mxu1 %v1072_v54  ;;  %2316 = vmatprep.mubr.msk.bf16.mxu1 %vm2583_vm3, %v2582_v20 }
 0x1f9   : > { %2326 = vmatprep.subr.bf16.mxu1 %v2582_v20 }
 0x1ff   : > { %2317 = vmatmul.mubr.msk.bf16.vlgmr.msra.gmra.mxu1 %vm632_vm2, %v2770_v36 }
 0x200   : > { %2327 = vmatpush3.bf16.msra.mxu1 %v1264_v56  ;;  %2328 = vmatprep.mubr.msk.bf16.mxu1 %vm2583_vm3, %v2582_v20 }
 0x201   : > { %2338 = vmatprep.subr.bf16.mxu1 %v2582_v20 }
 0x29f   : > { %v765_v57 = vpop.f32.mrf.mxu1 }
 0x2a0   : > { %v1114_v58 = vsel %vm632_vm2, %v765_v57, -inf }
 0x2a1   : > { %1115 = vmax.xlane.f32.xlu1 %v1114_v58  ;;  %v2276_v59 = vpop.f32.mrf.mxu1 }
 0x2a3   : > { %v768_v60 = vpop.f32.mrf.mxu1  ;;  %v863_v61 = vpop.f32.mrf.mxu0 }
 0x2a4   : > { %v1120_v62 = vsel %vm632_vm2, %v863_v61, -inf }
 0x2a5   : > { %v2277_v63 = vpop.f32.mrf.mxu1  ;;  %v2288_v0 = vpop.f32.mrf.mxu0  ;;  %1121 = vmax.xlane.f32.xlu0 %v1120_v62 }
 0x2a7   : > { %v814_v1 = vpop.f32.mrf.mxu1  ;;  %v866_v4 = vpop.f32.mrf.mxu0 }
 0x2a8   : > { %v1117_v5 = vsel %vm632_vm2, %v814_v1, -inf }
 0x2a9   : > { %v2282_v6 = vpop.f32.mrf.mxu1  ;;  %v2289_v7 = vpop.f32.mrf.mxu0  ;;  %1118 = vmax.xlane.f32.xlu0 %v1117_v5 }
 0x2ab   : > { %v817_v8 = vpop.f32.mrf.mxu1  ;;  %v961_v9 = vpop.f32.mrf.mxu0 }
 0x2ac   : > { %v1126_v10 = vsel %vm632_vm2, %v961_v9, -inf }
 0x2ad   : > { %v2283_v11 = vpop.f32.mrf.mxu1  ;;  %v2300_v12 = vpop.f32.mrf.mxu0  ;;  %1127 = vmax.xlane.f32.xlu0 %v1126_v10 }
 0x2af   : > { %v912_v13 = vpop.f32.mrf.mxu1  ;;  %v964_v14 = vpop.f32.mrf.mxu0 }
 0x2b0   : > { %v1123_v15 = vsel %vm632_vm2, %v912_v13, -inf }
 0x2b1   : > { %v2301_v16 = vpop.f32.mrf.mxu0  ;;  %1124 = vmax.xlane.f32.xlu1 %v1123_v15  ;;  %v2294_v17 = vpop.f32.mrf.mxu1 }
 0x2b3   : > { %v915_v18 = vpop.f32.mrf.mxu1  ;;  %v1059_v19 = vpop.f32.mrf.mxu0 }
 0x2b4   : > { %v1132_v21 = vsel %vm632_vm2, %v1059_v19, -inf }
 0x2b5   : > { %v2295_v22 = vpop.f32.mrf.mxu1  ;;  %v2312_v23 = vpop.f32.mrf.mxu0  ;;  %1133 = vmax.xlane.f32.xlu0 %v1132_v21 }
 0x2b7   : > { %v1010_v24 = vpop.f32.mrf.mxu1  ;;  %v1062_v25 = vpop.f32.mrf.mxu0 }
 0x2b8   : > { %v1129_v27 = vsel %vm632_vm2, %v1010_v24, -inf }
 0x2b9   : > { %v2313_v28 = vpop.f32.mrf.mxu0  ;;  %1130 = vmax.xlane.f32.xlu1 %v1129_v27  ;;  %v2306_v29 = vpop.f32.mrf.mxu1 }
 0x2bb   : > { %v1013_v32 = vpop.f32.mrf.mxu1 }
 0x2bd   : > { %v2307_v34 = vpop.f32.mrf.mxu1 }
 0x2bf   : > { %v1108_v37 = vpop.f32.mrf.mxu1 }
 0x2c0   : > { %v1135_v38 = vsel %vm632_vm2, %v1108_v37, -inf }
 0x2c1   : > { %1136 = vmax.xlane.f32.xlu1 %v1135_v38  ;;  %v2318_v39 = vpop.f32.mrf.mxu1 }
 0x2c3   : > { %v1111_v40 = vpop.f32.mrf.mxu1 }
 0x2c5   : > { %v2319_v41 = vpop.f32.mrf.mxu1 }
 0x2cb   : > { %1354 = vrot.lane.b32.xlu0 %v2758_v30, %s2581_s13 }
 0x2d2   : > { %1306 = vrot.lane.b32.xlu1 %v2753_v26, %s2581_s13 }
 0x32a   : > { %v1116_v42 = vpop.xlane.xlu1 %1115 }
 0x32b   : > { %v1138_v43 = vsub.f32 %v765_v57, %v1116_v42 }
 0x32d   : > { %v1146_v46 = vmul.f32 1.442695, %v1138_v43 }
 0x32e   : > { %v1122_v44 = vpop.xlane.xlu0 %1121 }
 0x32f   : > { %v1140_v45 = vsub.f32 %v863_v61, %v1122_v44 }
 0x331   : > { %v1150_v47 = vmul.f32 1.442695, %v1140_v45 }
 0x332   : > { %v1119_v48 = vpop.xlane.xlu0 %1118 }
 0x333   : > { %2487 = vpow2.f32 %v1150_v47  ;;  %v1139_v49 = vsub.f32 %v814_v1, %v1119_v48 }
 0x334   : > { %2489 = vpow2.f32 %v1146_v46 }
 0x335   : > { %v1148_v50 = vmul.f32 1.442695, %v1139_v49 }
 0x336   : > { %v1128_v55 = vpop.xlane.xlu0 %1127 }
 0x337   : > { %2491 = vpow2.f32 %v1148_v50  ;;  %v1142_v57 = vsub.f32 %v961_v9, %v1128_v55 }
 0x339   : > { %v1154_v61 = vmul.f32 1.442695, %v1142_v57 }
 0x33a   : > { %v1125_v56 = vpop.xlane.xlu1 %1124 }
 0x33b   : > { %v1141_v58 = vsub.f32 %v912_v13, %v1125_v56  ;;  %2493 = vpow2.f32 %v1154_v61 }
 0x33d   : > { %v1152_v63 = vmul.f32 1.442695, %v1141_v58 }
 0x33e   : > { %v1134_v59 = vpop.xlane.xlu0 %1133 }
 0x33f   : > { %v1144_v62 = vsub.f32 %v1059_v19, %v1134_v59  ;;  %2495 = vpow2.f32 %v1152_v63 }
 0x340   : > { %v2842_v51 = vpop.eup %2487 }
 0x341   : > { %v1168_v30 = vsel %vm632_vm2, %v2842_v51, 0.0  ;;  %v2490_v52 = vpop.eup %2489  ;;  %v1158_v4 = vmul.f32 1.442695, %v1144_v62 }
 0x342   : > { %1169 = vadd.xlane.f32.xlu0 %v1168_v30  ;;  %v1162_v53 = vsel %vm632_vm2, %v2490_v52, 0.0  ;;  %v1131_v60 = vpop.xlane.xlu1 %1130  ;;  %v1355_v16 = vpop.permute.xlu0 %1354 }
 0x343   : > { %v1143_v0 = vsub.f32 %v1010_v24, %v1131_v60  ;;  %2497 = vpow2.f32 %v1158_v4 }
 0x344   : > { %v2492_v26 = vpop.eup %2491 }
 0x345   : > { %v1165_v54 = vsel %vm632_vm2, %v2492_v26, 0.0  ;;  %v1156_v5 = vmul.f32 1.442695, %v1143_v0 }
 0x346   : > { %1163 = vadd.xlane.f32.xlu0 %v1162_v53  ;;  %1166 = vadd.xlane.f32.xlu1 %v1165_v54 }
 0x347   : > { %2499 = vpow2.f32 %v1156_v5 }
 0x34a   : > { %v1137_v1 = vpop.xlane.xlu1 %1136 }
 0x34b   : > { %v1145_v6 = vsub.f32 %v1108_v37, %v1137_v1 }
 0x34e   : > { %v1307_v17 = vpop.permute.xlu1 %1306 }
 0x357   : > { %1402 = vrot.lane.b32.xlu1 %v2760_v31, %s2581_s13  ;;  %v1160_v31 = vmul.f32 1.442695, %v1145_v6 }
 0x359   : > { %2501 = vpow2.f32 %v1160_v31 }
 0x35c   : > { %1450 = vrot.lane.b32.xlu0 %v2768_v35, %s2581_s13  ;;  %v2852_v35 = vpop.eup %2493 }
 0x35d   : > { %v2496_v7 = vpop.eup %2495  ;;  %v1174_v10 = vsel %vm632_vm2, %v2852_v35, 0.0 }
 0x35e   : > { %v2854_v8 = vpop.eup %2497  ;;  %v1171_v9 = vsel %vm632_vm2, %v2496_v7, 0.0 }
 0x35f   : > { %v2859_v11 = vpop.eup %2499  ;;  %v1180_v13 = vsel %vm632_vm2, %v2854_v8, 0.0 }
 0x360   : > { %v1177_v12 = vsel %vm632_vm2, %v2859_v11, 0.0 }
 0x366   : > { %v2865_v14 = vpop.eup %2501 }
 0x367   : > { %v1183_v15 = vsel %vm632_vm2, %v2865_v14, 0.0 }
 0x37b   : > { %1172 = vadd.xlane.f32.xlu1 %v1171_v9  ;;  %1175 = vadd.xlane.f32.xlu0 %v1174_v10 }
 0x37f   : > { %1178 = vadd.xlane.f32.xlu1 %v1177_v12  ;;  %1181 = vadd.xlane.f32.xlu0 %v1180_v13  ;;  %v2475_v12 = vld [vmem:[%s2683_s16 + $0x8] sm:$0xff]  }
 0x383   : > { %1184 = vadd.xlane.f32.xlu1 %v1183_v15 }
 0x394   : > { %1498 = vrot.lane.b32.xlu1 %v2762_v33, %s2581_s13  ;;  %v1360_v33 = vsel %vm645_vm1, %v1355_v16, 0 }
 0x395   : > { %1546 = vrot.lane.b32.xlu0 %v2770_v36, %s2581_s13  ;;  %v1312_v36 = vsel %vm645_vm1, %v1307_v17, 0  ;;  %s3044_s13 = scalar_lea.vmem %s3024_s7, %s2673_s26 }
 0x3cb   : > { %v1170_v18 = vpop.xlane.xlu0 %1169 }
 0x3cf   : > { %v1167_v19 = vpop.xlane.xlu1 %1166  ;;  %v1164_v21 = vpop.xlane.xlu0 %1163 }
 0x3d0   : > { %2503 = vrcp.f32 %v1167_v19 }
 0x3d1   : > { %2505 = vrcp.f32 %v1164_v21 }
 0x3d2   : > { %2507 = vrcp.f32 %v1170_v18 }
 0x3d3   : > { %v1403_v34 = vpop.permute.xlu1 %1402  ;;  %v1451_v39 = vpop.permute.xlu0 %1450 }
 0x3d4   : > { %v1408_v38 = vsel %vm645_vm1, %v1403_v34, 0 }
 0x3dd   : > { %v2504_v22 = vpop.eup %2503 }
 0x3de   : > { %v2506_v23 = vpop.eup %2505  ;;  %v1195_v24 = vmul.f32 %v2504_v22, %v2492_v26  ;;  %v1456_v26 = vsel %vm645_vm1, %v1451_v39, 0 }
 0x3df   : > { %v1194_v25 = vmul.f32 %v2506_v23, %v2490_v52  ;;  %v2508_v29 = vpop.eup %2507  ;;  %v2476_v23 = vld [vmem:[%s2683_s16] sm:$0xff]  }
 0x3e0   : > { %v1203_v27 = vpack.c.bf16 %v1195_v24, %v1195_v24  ;;  %v1196_v32 = vmul.f32 %v2508_v29, %v2842_v51 }
 0x3e1   : > { %v1202_v28 = vpack.c.bf16 %v1194_v25, %v1194_v25 }
 0x3e2   : > { %2329 = vmatmul.mubr.msk.bf16.vlgmr.msra.gmra.mxu1 %vm632_vm2, %v1203_v27  ;;  %v1204_v37 = vpack.c.bf16 %v1196_v32, %v1196_v32 }
 0x3e3   : > { %2323 = vmatmul.mubr.msk.bf16.vlgmr.msra.gmra.mxu0 %vm632_vm2, %v1202_v28  ;;  %2339 = vmatpush3.bf16.msra.mxu1 %v1360_v33 }
 0x3e4   : > { %2333 = vmatpush3.bf16.msra.mxu0 %v1312_v36  ;;  %2334 = vmatprep.mubr.msk.bf16.mxu0 %vm2583_vm3, %v2582_v20 }
 0x3e5   : > { %2344 = vmatprep.subr.bf16.mxu0 %v2582_v20  ;;  %2340 = vmatprep.mubr.msk.bf16.mxu1 %vm2583_vm3, %v2582_v20 }
 0x3e6   : > { %2350 = vmatprep.subr.bf16.mxu1 %v2582_v20 }
 0x3eb   : > { %2335 = vmatmul.mubr.msk.bf16.vlgmr.msra.gmra.mxu0 %vm632_vm2, %v1204_v37 }
 0x3ec   : > { %2345 = vmatpush3.bf16.msra.mxu0 %v1408_v38  ;;  %2346 = vmatprep.mubr.msk.bf16.mxu0 %vm2583_vm3, %v2582_v20 }
 0x3ed   : > { %2356 = vmatprep.subr.bf16.mxu0 %v2582_v20 }
 0x404   : > { %v1173_v40 = vpop.xlane.xlu1 %1172  ;;  %v1176_v41 = vpop.xlane.xlu0 %1175 }
 0x405   : > { %2509 = vrcp.f32 %v1173_v40 }
 0x406   : > { %2511 = vrcp.f32 %v1176_v41 }
 0x408   : > { %v1179_v42 = vpop.xlane.xlu1 %1178  ;;  %v1182_v43 = vpop.xlane.xlu0 %1181 }
 0x409   : > { %2513 = vrcp.f32 %v1179_v42 }
 0x40a   : > { %2515 = vrcp.f32 %v1182_v43 }
 0x40c   : > { %v1185_v44 = vpop.xlane.xlu1 %1184  ;;  %v1547_v56 = vpop.permute.xlu0 %1546 }
 0x40d   : > { %2517 = vrcp.f32 %v1185_v44  ;;  %v1552_v60 = vsel %vm645_vm1, %v1547_v56, 0 }
 0x410   : > { %v1499_v49 = vpop.permute.xlu1 %1498 }
 0x411   : > { %v1504_v53 = vsel %vm645_vm1, %v1499_v49, 0 }
 0x412   : > { %v2510_v45 = vpop.eup %2509 }
 0x413   : > { %v2512_v46 = vpop.eup %2511  ;;  %v1197_v47 = vmul.f32 %v2510_v45, %v2496_v7 }
 0x414   : > { %v1198_v48 = vmul.f32 %v2512_v46, %v2852_v35 }
 0x415   : > { %v1205_v50 = vpack.c.bf16 %v1197_v47, %v1197_v47 }
 0x416   : > { %v2514_v51 = vpop.eup %2513  ;;  %v1206_v30 = vpack.c.bf16 %v1198_v48, %v1198_v48 }
 0x417   : > { %v2516_v52 = vpop.eup %2515  ;;  %2341 = vmatmul.mubr.msk.bf16.vlgmr.msra.gmra.mxu1 %vm632_vm2, %v1205_v50  ;;  %v1199_v54 = vmul.f32 %v2514_v51, %v2859_v11 }
 0x418   : > { %2347 = vmatmul.mubr.msk.bf16.vlgmr.msra.gmra.mxu0 %vm632_vm2, %v1206_v30  ;;  %2351 = vmatpush3.bf16.msra.mxu1 %v1456_v26  ;;  %v1200_v55 = vmul.f32 %v2516_v52, %v2854_v8 }
 0x419   : > { %2357 = vmatpush3.bf16.msra.mxu0 %v1504_v53  ;;  %2352 = vmatprep.mubr.msk.bf16.mxu1 %vm2583_vm3, %v2582_v20  ;;  %v1207_v57 = vpack.c.bf16 %v1199_v54, %v1199_v54 }
 0x41a   : > { %2358 = vmatprep.mubr.msk.bf16.mxu0 %vm2583_vm3, %v2582_v20  ;;  %2362 = vmatprep.subr.bf16.mxu1 %v2582_v20  ;;  %v2518_v58 = vpop.eup %2517  ;;  %v1208_v59 = vpack.c.bf16 %v1200_v55, %v1200_v55  ;;  %v2182_v55 = vld [vmem:[%s3041_s28] ss:$0 sm:$0xff] }
 0x41b   : > { %2368 = vmatprep.subr.bf16.mxu0 %v2582_v20  ;;  %v1201_v61 = vmul.f32 %v2518_v58, %v2865_v14 }
 0x41d   : > { %v1209_v62 = vpack.c.bf16 %v1201_v61, %v1201_v61 }
 0x41f   : > { %2353 = vmatmul.mubr.msk.bf16.vlgmr.msra.gmra.mxu1 %vm632_vm2, %v1207_v57 }
 0x420   : > { %2359 = vmatmul.mubr.msk.bf16.vlgmr.msra.gmra.mxu0 %vm632_vm2, %v1208_v59  ;;  %2363 = vmatpush3.bf16.msra.mxu1 %v1552_v60 }
 0x421   : > { %2364 = vmatprep.mubr.msk.bf16.mxu1 %vm2583_vm3, %v2582_v20  ;;  %2372 = vmatprep.mubr.msk.bf16.mxu0 %vm2583_vm3, %v2582_v20 }
 0x422   : > { %2376 = vmatprep.subr.bf16.mxu1 %v2582_v20  ;;  %2369 = vmatpush3.bf16.msra.mxu0 %v2475_v12  ;;  %v2479_v12 = vld [vmem:[%s2710_s19 + $0x38] sm:$0xff]  }
 0x423   : > { %2370 = vmatprep.subr.bf16.mxu0 %v2582_v20 }
 0x426   : > { %2371 = vmatpush3.bf16.msra.mxu0 %v2476_v23 }
 0x427   : > { %2365 = vmatmul.mubr.msk.bf16.vlgmr.msra.gmra.mxu1 %vm632_vm2, %v1209_v62  ;;  %2384 = vmatprep.subr.bf16.mxu0 %v2582_v20 }
 0x428   : > { %2380 = vmatprep.mubr.msk.bf16.mxu1 %vm2583_vm3, %v2582_v20 }
 0x4a2   : > { %v1300_v63 = vpop.f32.mrf.mxu1 }
 0x4a3   : > { %v1252_v0 = vpop.f32.mrf.mxu0 }
 0x4a4   : > { %v2330_v1 = vpop.f32.mrf.mxu1 }
 0x4a5   : > { %v2324_v4 = vpop.f32.mrf.mxu0 }
 0x4a6   : > { %v1303_v5 = vpop.f32.mrf.mxu1 }
 0x4a7   : > { %v1255_v6 = vpop.f32.mrf.mxu0 }
 0x4a8   : > { %v2331_v31 = vpop.f32.mrf.mxu1 }
 0x4a9   : > { %v2325_v35 = vpop.f32.mrf.mxu0 }
 0x4ab   : > { %v1348_v7 = vpop.f32.mrf.mxu0 }
 0x4ad   : > { %v2336_v8 = vpop.f32.mrf.mxu0 }
 0x4af   : > { %v1351_v9 = vpop.f32.mrf.mxu0 }
 0x4b1   : > { %v2337_v10 = vpop.f32.mrf.mxu0 }
 0x4b2   : > { %v2477_v10 = vld [vmem:[%s2700_s27 + $0x8] sm:$0xff]  }
 0x4b3   : > { %2377 = vmatpush3.bf16.msra.mxu1 %v2477_v10 }
 0x4b4   : > { %2378 = vmatprep.subr.bf16.mxu1 %v2582_v20 }
 0x4d7   : > { %v1396_v11 = vpop.f32.mrf.mxu1 }
 0x4d8   : > { %v2460_v13 = vpack.i.bf16 %v1396_v11, %v1348_v7  ;;  %v1444_v14 = vpop.f32.mrf.mxu0  ;;  %v2478_v11 = vld [vmem:[%s2700_s27] sm:$0xff]   ;;  %s2587_s27 = smov [#allocation2]  }
 0x4d9   : > { %v2342_v15 = vpop.f32.mrf.mxu1  ;;  %2379 = vmatpush3.bf16.msra.mxu1 %v2478_v11  ;;  %v2201_v11 = vld [vmem:[%s590_s0] ss:$0 sm:$0xff]  ;;  %s1982_s29 = sshll.u32 %s2587_s27, 4  ;;  %s1983_s29 = int_to_ptr.vmem [resolvable:$true] %s1982_s29 }
 0x4da   : > { %v2348_v16 = vpop.f32.mrf.mxu0  ;;  %2461 = vrot.lane.b32.xlu1 %v2460_v13, %s2584_s18  ;;  %v2480_v13 = vld [vmem:[%s2710_s19 + $0x30] sm:$0xff]   ;;  %v2482_v15 = vld [vmem:[%s2710_s19 + $0x20] sm:$0xff]   ;;  %p2534_p10 = scmp.lt.s32.totalorder %s1983_s29, %s1983_s29 }
 0x4db   : > { %v1399_v17 = vpop.f32.mrf.mxu1  ;;  %v2483_v16 = vld [vmem:[%s2710_s19 + $0x18] sm:$0xff]  }
 0x4dc   : > { %v1447_v18 = vpop.f32.mrf.mxu0 }
 0x4dd   : > { %v2343_v19 = vpop.f32.mrf.mxu1 }
 0x4de   : > { %v2349_v21 = vpop.f32.mrf.mxu0 }
 0x4df   : > { %v1492_v22 = vpop.f32.mrf.mxu1 }
 0x4e0   : > { %v2465_v24 = vpack.i.bf16 %v1492_v22, %v1444_v14  ;;  %v1540_v25 = vpop.f32.mrf.mxu0  ;;  %v2481_v14 = vld [vmem:[%s2710_s19 + $0x28] sm:$0xff]  }
 0x4e1   : > { %v2354_v27 = vpop.f32.mrf.mxu1 }
 0x4e2   : > { %v2360_v28 = vpop.f32.mrf.mxu0  ;;  %2466 = vrot.lane.b32.xlu0 %v2465_v24, %s2585_s24  ;;  %v2186_v27 = vld [vmem:[%s3042_s30] ss:$0 sm:$0xff] }
 0x4e3   : > { %v1495_v29 = vpop.f32.mrf.mxu1 }
 0x4e4   : > { %v1543_v33 = vpop.f32.mrf.mxu0 }
 0x4e5   : > { %v2355_v36 = vpop.f32.mrf.mxu1 }
 0x4e6   : > { %v2361_v32 = vpop.f32.mrf.mxu0  ;;  %v2187_v36 = vld [vmem:[%s3043_s17] ss:$0 sm:$0xff] }
 0x4e7   : > { %v1588_v34 = vpop.f32.mrf.mxu1 }
 0x4e8   : > { %v2470_v37 = vpack.i.bf16 %v1588_v34, %v1540_v25 }
 0x4e9   : > { %v2366_v38 = vpop.f32.mrf.mxu1 }
 0x4ea   : > { %2471 = vrot.lane.b32.xlu1 %v2470_v37, %s2586_s20 }
 0x4eb   : > { %v1591_v39 = vpop.f32.mrf.mxu1 }
 0x4ec   : > { %v2484_v39 = vld [vmem:[%s2710_s19 + $0x10] sm:$0xff]  }
 0x4ed   : > { %v2367_v40 = vpop.f32.mrf.mxu1 }
 0x4ee   : > { %v2485_v40 = vld [vmem:[%s2710_s19 + $0x8] sm:$0xff]  }
 0x54c   : > { %v2462_v41 = vpop.permute.xlu1 %2461 }
 0x54d   : > { %v2464_v43 = vunpack.i.h.bf16 %v2462_v41  ;;  %v2463_v44 = vunpack.i.l.bf16 %v2462_v41  ;;  %v2486_v41 = vld [vmem:[%s2710_s19] sm:$0xff]   ;;  %s3045_s19 = sld [smem:[#allocation6_spill]] }
 0x54f   : > { %v1619_v48 = vsel %vm632_vm2, %v1300_v63, %v2464_v43  ;;  %v1618_v49 = vsel %vm632_vm2, %v1252_v0, %v2463_v44 }
 0x553   : > { %s3046_s30 = sadd.s32 4294967295, %s3045_s19  }
 0x554   : > { %v2467_v42 = vpop.permute.xlu0 %2466  ;;  %p2991_p6 = scmp.eq.s32.totalorder %s3046_s30, 1 }
 0x555   : > { %v2469_v45 = vunpack.i.h.bf16 %v2467_v42  ;;  %v2468_v46 = vunpack.i.l.bf16 %v2467_v42  ;;  %v2188_v42 = vld [vmem:[%s3044_s13] ss:$0 sm:$0xff] }
 0x557   : > { %v1622_v30 = vsel %vm1620_vm4, %v1619_v48, %v2469_v45  ;;  %v1621_v52 = vsel %vm1620_vm4, %v1618_v49, %v2468_v46 }
 0x55c   : > { %v2472_v47 = vpop.permute.xlu1 %2471 }
 0x55d   : > { %v2474_v50 = vunpack.i.h.bf16 %v2472_v47  ;;  %v2473_v51 = vunpack.i.l.bf16 %v2472_v47 }
 0x55f   : > { %v1624_v26 = vsel %vm1623_vm5, %v1621_v52, %v2473_v51  ;;  %v1625_v53 = vsel %vm1623_vm5, %v1622_v30, %v2474_v50 }
 0x560   : > { %v1626_v54 = vpack.c.bf16 %v1625_v53, %v1624_v26 }
 0x562   : > { %2373 = vmatmul.mubr.msk.bf16.vlgmr.msra.gmra.mxu0 %vm1650_vm6, %v1626_v54 }
 0x563   : > { %2400 = vmatprep.mubr.msk.bf16.mxu0 %vm2583_vm3, %v2582_v20  ;;  %2385 = vmatpush3.bf16.msra.mxu0 %v2479_v12 }
 0x564   : > { %2386 = vmatprep.subr.bf16.mxu0 %v2582_v20 }
 0x567   : > { %2387 = vmatpush3.bf16.msra.mxu0 %v2480_v13  ;;  %v2202_v13 = vld [vmem:[%s593_s25] ss:$0 sm:$0xff]  ;;  %s2527_s25 = scalar_lea.vmem %s1983_s29, 256 }
 0x568   : > { %2388 = vmatprep.subr.bf16.mxu0 %v2582_v20  ;;  %p2528_p7 = scmp.ne.s32.totalorder %s1983_s29, %s2527_s25  ;;  %p2535_p11 = scmp.lt.s32.totalorder %s2527_s25, %s2527_s25 }
 0x56a   : > { %p2529_p8 = pnand %p2528_p7, %p2991_p6  ;;  %p2536_p12 = por %p2535_p11, %p2534_p10 }
 0x56b   : > { %2389 = vmatpush3.bf16.msra.mxu0 %v2481_v14 }
 0x56c   : > { %2390 = vmatprep.subr.bf16.mxu0 %v2582_v20  ;;  %p2530_p9 = pneg %p2529_p8 }
 0x56e   : > { %p2537_p13 = pnand %p2536_p12, %p2530_p9 }
 0x56f   : > { %2391 = vmatpush3.bf16.msra.mxu0 %v2482_v15 }
 0x570   : > { %2392 = vmatprep.subr.bf16.mxu0 %v2582_v20 }
 0x573   : > { %2393 = vmatpush3.bf16.msra.mxu0 %v2483_v16 }
 0x574   : > { %2394 = vmatprep.subr.bf16.mxu0 %v2582_v20 }
 0x577   : > { %2395 = vmatpush3.bf16.msra.mxu0 %v2484_v39 }
 0x578   : > { %2396 = vmatprep.subr.bf16.mxu0 %v2582_v20 }
 0x57b   : > { %2397 = vmatpush3.bf16.msra.mxu0 %v2485_v40 }
 0x57c   : > { %2398 = vmatprep.subr.bf16.mxu0 %v2582_v20  ;;  %v2192_v20 = vld [vmem:[%s587_s12] ss:$0 sm:$0xff] }
 0x57f   : > { %2399 = vmatpush3.bf16.msra.mxu0 %v2486_v41 }
 0x622   : > { %v1688_v56 = vpop.f32.mrf.mxu0 }
 0x623   : > { %v1689_v57 = vadd.f32 %v2182_v55, %v1688_v56 }
 0x624   : > { %v2374_v58 = vpop.f32.mrf.mxu0 }
 0x625   : > { %v1695_v59 = vadd.f32 %v1689_v57, %v2730_v2 }
 0x626   : > { %v1691_v60 = vpop.f32.mrf.mxu0 }
 0x627   : > { %v1692_v61 = vadd.f32 %v2182_v55, %v1691_v60  ;;  %v1699_v62 = vsel %vm1650_vm6, %v1695_v59, 0.0 }
 0x628   : > { %1700 = vadd.xlane.f32.xlu0 %v1699_v62  ;;  %v2375_v63 = vpop.f32.mrf.mxu0 }
 0x629   : > { %v1696_v0 = vadd.f32 %v1692_v61, %v2732_v3 }
 0x62b   : > { %v1702_v1 = vsel %vm1650_vm6, %v1696_v0, 0.0 }
 0x62c   : > { %1703 = vadd.xlane.f32.xlu1 %v1702_v1 }
 0x6b1   : > { %v1701_v4 = vpop.xlane.xlu0 %1700 }
 0x6b2   : > { %v1706_v5 = vmul.f32 0.03125, %v1701_v4 }
 0x6b4   : > { %v1708_v6 = vsub.f32 %v1695_v59, %v1706_v5 }
 0x6b5   : > { %v1704_v31 = vpop.xlane.xlu1 %1703 }
 0x6b6   : > { %v1707_v2 = vmul.f32 0.03125, %v1704_v31  ;;  %v1710_v35 = vmul.f32 %v1708_v6, %v1708_v6 }
 0x6b8   : > { %v1709_v7 = vsub.f32 %v1696_v0, %v1707_v2  ;;  %v1712_v8 = vsel %vm1650_vm6, %v1710_v35, 0.0 }
 0x6b9   : > { %1713 = vadd.xlane.f32.xlu0 %v1712_v8 }
 0x6ba   : > { %v1711_v9 = vmul.f32 %v1709_v7, %v1709_v7 }
 0x6bc   : > { %v1715_v3 = vsel %vm1650_vm6, %v1711_v9, 0.0 }
 0x6bd   : > { %1716 = vadd.xlane.f32.xlu0 %v1715_v3 }
 0x742   : > { %v1714_v17 = vpop.xlane.xlu0 %1713 }
 0x743   : > { %v1718_v18 = vmul.f32 0.03125, %v1714_v17 }
 0x745   : > { %v1720_v19 = vadd.f32 1e-05, %v1718_v18 }
 0x746   : > { %v1717_v21 = vpop.xlane.xlu0 %1716 }
 0x747   : > { %2519 = vrsqrt.f32 %v1720_v19  ;;  %v1719_v22 = vmul.f32 0.03125, %v1717_v21 }
 0x749   : > { %v1721_v23 = vadd.f32 1e-05, %v1719_v22 }
 0x74b   : > { %2521 = vrsqrt.f32 %v1721_v23 }
 0x754   : > { %v2520_v24 = vpop.eup %2519 }
 0x755   : > { %v1724_v25 = vmul.f32 %v2520_v24, %v1708_v6 }
 0x757   : > { %v1732_v33 = vmul.f32 %v2186_v27, %v1724_v25 }
 0x758   : > { %v2522_v28 = vpop.eup %2521 }
 0x759   : > { %v1725_v29 = vmul.f32 %v2522_v28, %v1709_v7  ;;  %v1740_v34 = vadd.f32 %v2187_v36, %v1732_v33 }
 0x75b   : > { %v1733_v32 = vmul.f32 %v2186_v27, %v1725_v29 }
 0x75d   : > { %v1741_v37 = vadd.f32 %v2187_v36, %v1733_v32 }
 0x75f   : > { %v1742_v38 = vpack.c.bf16 %v1741_v37, %v1740_v34 }
 0x761   : > { %2381 = vmatmul.mubr.msk.bf16.vlgmr.msra.gmra.mxu1 %vm1650_vm6, %v1742_v38 }
 0x821   : > { %v1803_v43 = vpop.f32.mrf.mxu1 }
 0x822   : > { %v1804_v45 = vadd.f32 %v2188_v42, %v1803_v43 }
 0x823   : > { %v2382_v44 = vpop.f32.mrf.mxu1 }
 0x824   : > { %v1810_v49 = vmax.f32 %v1804_v45, 0.0 }
 0x825   : > { %v1806_v46 = vpop.f32.mrf.mxu1 }
 0x826   : > { %v1807_v47 = vadd.f32 %v2188_v42, %v1806_v46 }
 0x827   : > { %v2383_v48 = vpop.f32.mrf.mxu1 }
 0x828   : > { %v1811_v50 = vmax.f32 %v1807_v47, 0.0 }
 0x82a   : > { %v1812_v51 = vpack.c.bf16 %v1811_v50, %v1810_v49 }
 0x82c   : > { %2401 = vmatmul.mubr.bf16.vlgmr.msra.gmra.mxu0 %v1812_v51 }
 0x8ec   : > { %v1918_v30 = vpop.f32.mrf.mxu0 }
 0x8ed   : > { %v1919_v52 = vadd.f32 %v2192_v20, %v1918_v30 }
 0x8ee   : > { %v2402_v26 = vpop.f32.mrf.mxu0 }
 0x8ef   : > { %v1925_v53 = vadd.f32 %v1919_v52, %v1740_v34 }
 0x8f0   : > { %v1921_v54 = vpop.f32.mrf.mxu0 }
 0x8f1   : > { %v1922_v55 = vadd.f32 %v2192_v20, %v1921_v54  ;;  %v1929_v56 = vsel %vm1650_vm6, %v1925_v53, 0.0 }
 0x8f2   : > { %1930 = vadd.xlane.f32.xlu1 %v1929_v56  ;;  %v2403_v57 = vpop.f32.mrf.mxu0 }
 0x8f3   : > { %v1926_v58 = vadd.f32 %v1922_v55, %v1741_v37 }
 0x8f5   : > { %v1932_v59 = vsel %vm1650_vm6, %v1926_v58, 0.0 }
 0x8f6   : > { %1933 = vadd.xlane.f32.xlu0 %v1932_v59 }
 0x97b   : > { %v1931_v60 = vpop.xlane.xlu1 %1930 }
 0x97c   : > { %v1935_v61 = vmul.f32 0.03125, %v1931_v60 }
 0x97e   : > { %v1937_v62 = vsub.f32 %v1925_v53, %v1935_v61 }
 0x97f   : > { %v1934_v63 = vpop.xlane.xlu0 %1933 }
 0x980   : > { %v1936_v0 = vmul.f32 0.03125, %v1934_v63  ;;  %v1939_v1 = vmul.f32 %v1937_v62, %v1937_v62 }
 0x982   : > { %v1938_v4 = vsub.f32 %v1926_v58, %v1936_v0  ;;  %v1941_v5 = vsel %vm1650_vm6, %v1939_v1, 0.0 }
 0x983   : > { %1942 = vadd.xlane.f32.xlu1 %v1941_v5 }
 0x984   : > { %v1940_v6 = vmul.f32 %v1938_v4, %v1938_v4 }
 0x986   : > { %v1944_v31 = vsel %vm1650_vm6, %v1940_v6, 0.0 }
 0x987   : > { %1945 = vadd.xlane.f32.xlu0 %v1944_v31 }
 0xa0c   : > { %v1943_v2 = vpop.xlane.xlu1 %1942 }
 0xa0d   : > { %v1947_v35 = vmul.f32 0.03125, %v1943_v2 }
 0xa0f   : > { %v1949_v7 = vadd.f32 1e-05, %v1947_v35 }
 0xa10   : > { %v1946_v8 = vpop.xlane.xlu0 %1945 }
 0xa11   : > { %2523 = vrsqrt.f32 %v1949_v7  ;;  %v1948_v9 = vmul.f32 0.03125, %v1946_v8 }
 0xa13   : > { %v1950_v3 = vadd.f32 1e-05, %v1948_v9 }
 0xa15   : > { %2525 = vrsqrt.f32 %v1950_v3 }
 0xa1e   : > { %v2524_v10 = vpop.eup %2523 }
 0xa1f   : > { %v1953_v12 = vmul.f32 %v2524_v10, %v1937_v62 }
 0xa21   : > { %v1961_v14 = vmul.f32 %v2201_v11, %v1953_v12 }
 0xa22   : > { %v2526_v15 = vpop.eup %2525 }
 0xa23   : > { %v1954_v16 = vmul.f32 %v2526_v15, %v1938_v4  ;;  %v1969_v17 = vadd.f32 %v2202_v13, %v1961_v14 }
 0xa25   : > { %v1962_v18 = vmul.f32 %v2201_v11, %v1954_v16  ;;  %1971 = vst.msk [vmem:[#allocation2] sm:$0xff] %vm1650_vm6, %v1969_v17 }
 0xa27   : > { %v1970_v19 = vadd.f32 %v2202_v13, %v1962_v18 }
 0xa29   : > { %1972 = vst.msk [vmem:[#allocation2 + $0x8] sm:$0xff] %vm1650_vm6, %v1970_v19 }
 0xa2a   : > { %2540 = shalt.err (!%p2537_p13)
}
 0xa2b   : > { %s2588_s26 = smov 128   ;;  %s3048_s17 = sld [smem:[#allocation10_spill]] }
 0xa31   : > { %2406 = dma.vmem_to_hbm [thread:$0]  (%p2991_p6), %s1983_s29, 256, %s3048_s17, [#allocation3], %s2588_s26, %s2588_s26, %s2584_s18  }
 0xa32   : > { %2564 = dma.done.wait (%p2991_p6), [#allocation3], 256  }
 0xa33   : > { %2566 = vsyncadd (%p2991_p6), [#allocation3], 4294967040 }
 0xa34 PF: > { %s3049_s21 = sld [smem:[#allocation6_spill]] }
 0xa35   : > { %s3051_s22 = sld [smem:[#allocation7_spill]] }
 0xa3a   : > { %s23_s23 = sadd.s32 1, %s3049_s21   ;;  %s3050_s21 = sld [smem:[#allocation5_spill]] }
 0xa3b   : > { %p20_p0 = scmp.ge.s32.totalorder %s23_s23, 4  }
 0xa3d   :  { %22 = sbr.rel (!%p20_p0) target bundleno = 6 (0x6), region = 133 }
 0xa42   :  { %1998 = vsyncpa [#allocation3], 1 }
 0xa43   :  { %2000 = vsyncpa [#allocation3 + $0x1], 1 }

</bundles_post_ra>
